<compile_context>
chip_gen: v6e
topology: v6e:2x2x1
jax: 0.10.0
libtpu: 0.0.40
codegen_flags: <defaults>
</compile_context>

<pallas_src>
import functools
import math

import jax
import jax.numpy as jnp
from jax import lax
from jax.experimental import pallas as pl
from jax.experimental.pallas import tpu as pltpu

# PatchLoss / AdMSoftmaxLoss hyper-parameters (module defaults).
S = 30.0
M_L = 0.4
M_S = 0.1
ALPHA1 = 1.0
ALPHA2 = 1.0
EPS = 1e-12  # torch.nn.functional.normalize default eps
DESCRIPTOR_SIZE = 256
OUT_FEATURES = 2


def _round_up(x, m):
    return (x + m - 1) // m * m


def _num_tensorcores():
    """Best-effort TensorCores-per-chip (2 on a v7x megacore). Never raises."""
    try:
        info = pltpu.get_tpu_info()
        for name in ("num_cores", "core_count", "num_tensorcores",
                     "tensorcores_per_chip"):
            v = getattr(info, name, None)
            if isinstance(v, int) and 0 < v <= 8:
                return v
    except Exception:
        pass
    return 2  # previous behaviour; a length-2 "parallel" axis is harmless on 1-TC chips


def patch_loss_kernel(x1_ref, x2_ref, lab_ref, w_ref, out_ref, *, inv_n, inv_nd):
    t = pl.program_id(1)

    # Output block = per-split scalar accumulator (same block index along the
    # "arbitrary" tile axis) -> zero it on the first tile of each split.
    @pl.when(t == 0)
    def _():
        out_ref[...] = jnp.zeros_like(out_ref)

    x1 = x1_ref[...].astype(jnp.float32)                     # (tn, D)
    x2 = x2_ref[...].astype(jnp.float32)                     # (tn, D)
    w = w_ref[...].astype(jnp.float32)                       # (2, D); NOT normalized (see header)
    wdiff = w[0:1, :] - w[1:2, :]                            # (1, D): only wf0 - wf1 is needed

    # The only tile-sized work: 5 multiply passes + 5 lane reductions over (tn, D).
    sumsq1 = jnp.sum(x1 * x1, axis=1, keepdims=True)         # (tn, 1)
    sumsq2 = jnp.sum(x2 * x2, axis=1, keepdims=True)
    cross = jnp.sum(x1 * x2, axis=1, keepdims=True)
    d1 = jnp.sum(x1 * wdiff, axis=1, keepdims=True)          # x1 . (w0 - w1)
    d2 = jnp.sum(x2 * wdiff, axis=1, keepdims=True)

    # 1 / max(||x||, eps)  ==  rsqrt(max(||x||^2, eps^2))
    inv1 = lax.rsqrt(jnp.maximum(sumsq1, EPS * EPS))
    inv2 = lax.rsqrt(jnp.maximum(sumsq2, EPS * EPS))

    # SimilarityLoss per row: ||xn1 - xn2||^2 = ||xn1||^2 + ||xn2||^2 - 2 xn1.xn2.
    # Exact sumsq*inv^2 form keeps near-zero rows bit-compatible with F.normalize.
    n1 = sumsq1 * (inv1 * inv1)
    n2 = sumsq2 * (inv2 * inv2)
    sim_rows = n1 + n2 - 2.0 * ((cross * inv1) * inv2)

    # AM-softmax: -L = softplus(S*(other - target + m)); only wf0-wf1 matters.
    # Fused select: label==1 -> S*((wf0-wf1) + M_L); label==0 -> S*(M_S - (wf0-wf1)).
    lab_is1 = lab_ref[...] == 1                              # (tn, 1) bool
    wfd1 = d1 * inv1                                         # wf0 - wf1, branch 1
    wfd2 = d2 * inv2                                         # wf0 - wf1, branch 2
    z1 = S * jnp.where(lab_is1, wfd1 + M_L, M_S - wfd1)
    z2 = S * jnp.where(lab_is1, wfd2 + M_L, M_S - wfd2)

    # Stable softplus: max(z,0) + log(1 + exp(-|z|)).  (log(1+u) kept instead of
    # log1p for guaranteed Mosaic lowering; accuracy delta here is < 1e-7 abs.)
    sp1 = jnp.maximum(z1, 0.0) + jnp.log(1.0 + jnp.exp(-jnp.abs(z1)))
    sp2 = jnp.maximum(z2, 0.0) + jnp.log(1.0 + jnp.exp(-jnp.abs(z2)))

    partial = (ALPHA1 * inv_nd) * jnp.sum(sim_rows) + (ALPHA2 * inv_n) * jnp.sum(sp1 + sp2)
    out_ref[...] = out_ref[...] + partial


def patch_loss(x1, x2, label, weight, *, tn=2048):
    """x1, x2: (N, D); label: (N,) in {0,1}; weight: (OUT_FEATURES, D) (nn.Linear layout)."""
    N, D = x1.shape
    assert x2.shape == (N, D)
    assert weight.shape == (OUT_FEATURES, D)

    # Tile size: multiple of 8 sublanes, no larger than the (padded) batch.
    # tn=2048 -> 2 inputs x 2 pipeline buffers x 2 MiB (f32) = 8 MiB of x-blocks
    # plus ~2 MiB lane-padded label blocks: safe on v5e/v6e/v7x scoped VMEM.
    tn_eff = min(tn, _round_up(max(N, 8), 8))
    tiles = -(-N // tn_eff)
    # Split the N reduction across TensorCores when the chip has >1 (v7x megacore).
    num_splits = 2 if (tiles >= 2 and _num_tensorcores() >= 2) else 1
    tiles_per_split = -(-tiles // num_splits)
    n_pad = num_splits * tiles_per_split * tn_eff

    lab2d = label.astype(jnp.int32).reshape(-1, 1)
    if n_pad != N:
        pad = ((0, n_pad - N), (0, 0))
        x1 = jnp.pad(x1, pad)        # caller dtype preserved; cast happens in-kernel
        x2 = jnp.pad(x2, pad)
        lab2d = jnp.pad(lab2d, pad)

    kernel = functools.partial(patch_loss_kernel, inv_n=1.0 / N, inv_nd=1.0 / (N * D))

    row_block = lambda c, t: (c * tiles_per_split + t, 0)
    partials = pl.pallas_call(
        kernel,
        out_shape=jax.ShapeDtypeStruct((num_splits, 1, 1), jnp.float32),
        grid_spec=pltpu.PrefetchScalarGridSpec(
            num_scalar_prefetch=0,
            grid=(num_splits, tiles_per_split),
            in_specs=[
                pl.BlockSpec((tn_eff, D), row_block),
                pl.BlockSpec((tn_eff, D), row_block),
                pl.BlockSpec((tn_eff, 1), row_block),
                pl.BlockSpec((OUT_FEATURES, D), lambda c, t: (0, 0)),
            ],
            out_specs=pl.BlockSpec((1, 1, 1), lambda c, t: (c, 0, 0)),
        ),
        compiler_params=pltpu.CompilerParams(
            dimension_semantics=("parallel", "arbitrary"),
            vmem_limit_bytes=32 * 1024 * 1024,
        ),
    )(x1, x2, lab2d, weight)

    loss = jnp.sum(partials)
    if n_pad != N:
        # Padded rows (x = 0, label = 0) contribute exactly softplus(S*M_S) to each
        # AM-softmax branch and 0 to the similarity term; remove them in closed form
        # instead of masking in-kernel.
        sp_pad = S * M_S + math.log1p(math.exp(-S * M_S))
        loss = loss - ALPHA2 * (2.0 * (n_pad - N) * sp_pad) / N
    return loss


def ref_patch_loss(x1, x2, label, weight):
    """Pure-JAX reference mirroring the PyTorch forward pass."""
    def normalize(v):
        n = jnp.sqrt(jnp.sum(v * v, axis=1, keepdims=True))
        return v / jnp.maximum(n, EPS)

    def amsm(x, lab):
        xn = normalize(x)
        wf = xn @ weight.T                       # weights intentionally NOT normalized
        idx = jnp.arange(x.shape[0])
        m = jnp.where(lab == 1, M_L, M_S)
        tgt = wf[idx, lab]
        oth = wf[idx, 1 - lab]
        num = S * (tgt - m)
        den = jnp.exp(num) + jnp.exp(S * oth)
        return -jnp.mean(num - jnp.log(den))

    a1 = amsm(x1, label)
    a2 = amsm(x2, label)
    sim = jnp.mean((normalize(x1) - normalize(x2)) ** 2)
    return ALPHA1 * sim + ALPHA2 * (a1 + a2)


if __name__ == "__main__":
    N, D = 24, DESCRIPTOR_SIZE

    key = jax.random.PRNGKey(0)
    k1, k2, k3, k4 = jax.random.split(key, 4)

    x1 = jax.random.normal(k1, (N, D), dtype=jnp.float32)
    x2 = jax.random.normal(k2, (N, D), dtype=jnp.float32)
    label = jax.random.bernoulli(k3, 0.5, (N,)).astype(jnp.int32)

    # Deterministic nn.Linear(256, 2, bias=False)-style init: U(-1/sqrt(D), 1/sqrt(D)).
    bound = 1.0 / (D ** 0.5)
    weight = jax.random.uniform(
        k4, (OUT_FEATURES, D), minval=-bound, maxval=bound, dtype=jnp.float32
    )

    ref = jax.block_until_ready(ref_patch_loss(x1, x2, label, weight))

    # tn=2048 -> single-tile path; tn=8 -> multi-tile grid, split axis, and the
    # padded-row closed-form correction all exercised.
    for tile_n in (2048, 8):
        loss = jax.block_until_ready(patch_loss(x1, x2, label, weight, tn=tile_n))
        assert jnp.isfinite(loss), f"non-finite loss (tn={tile_n}): {loss}"
        assert jnp.allclose(loss, ref, rtol=1e-4, atol=1e-4), (
            f"mismatch (tn={tile_n}): {loss} vs {ref}"
        )

    print("KERNEL_OK")
</pallas_src>

<mosaic_0001>
module attributes {stable_mosaic.version = 11 : i64} {
  func.func @patch_loss_kernel(%arg0: i32, %arg1: i32, %arg2: memref<24x256xf32, #tpu.memory_space<vmem>>, %arg3: memref<24x256xf32, #tpu.memory_space<vmem>>, %arg4: memref<24x1xi32, #tpu.memory_space<vmem>>, %arg5: memref<2x256xf32, #tpu.memory_space<vmem>>, %arg6: memref<1x1x1xf32, #tpu.memory_space<vmem>>) attributes {dimension_semantics = [#tpu.dimension_semantics<parallel>, #tpu.dimension_semantics<arbitrary>], iteration_bounds = array<i64: 1, 1>, scalar_prefetch = 0 : i64, scratch_operands = 0 : i64, tpu.core_type = #tpu.core_type<tc>, window_params = [{transform_indices = @transform_0, window_bounds = array<i64: 24, 256>}, {transform_indices = @transform_1, window_bounds = array<i64: 24, 256>}, {transform_indices = @transform_2, window_bounds = array<i64: 24, 1>}, {pipeline_mode = #tpu.pipeline_mode<synchronous>, transform_indices = @transform_3, window_bounds = array<i64: 2, 256>}, {transform_indices = @transform_4, window_bounds = array<i64: 1, 1, 1>}]} {
    %c0_i32 = arith.constant 0 : i32
    %0 = arith.cmpi eq, %arg1, %c0_i32 : i32
    %1 = arith.extui %0 : i1 to i32
    %c0_i32_0 = arith.constant 0 : i32
    %2 = arith.cmpi ne, %1, %c0_i32_0 : i32
    scf.if %2 {
      %cst_37 = arith.constant 0.000000e+00 : f32
      %97 = vector.broadcast %cst_37 : f32 to vector<1x1x1xf32>
      %c0_38 = arith.constant 0 : index
      %c0_39 = arith.constant 0 : index
      %c0_40 = arith.constant 0 : index
      %98 = vector.load %arg6[%c0_38, %c0_39, %c0_40] : memref<1x1x1xf32, #tpu.memory_space<vmem>>, vector<1x1x1xf32>
      tpu.vector_store %arg6[%c0_38, %c0_39, %c0_40], %97 {strides = array<i32>} : memref<1x1x1xf32, #tpu.memory_space<vmem>>, vector<1x1x1xf32>,
    } else {
    }
    %c0 = arith.constant 0 : index
    %c0_1 = arith.constant 0 : index
    %3 = vector.load %arg2[%c0, %c0_1] : memref<24x256xf32, #tpu.memory_space<vmem>>, vector<24x256xf32>
    %c0_2 = arith.constant 0 : index
    %c0_3 = arith.constant 0 : index
    %4 = vector.load %arg3[%c0_2, %c0_3] : memref<24x256xf32, #tpu.memory_space<vmem>>, vector<24x256xf32>
    %c0_4 = arith.constant 0 : index
    %c0_5 = arith.constant 0 : index
    %5 = vector.load %arg5[%c0_4, %c0_5] : memref<2x256xf32, #tpu.memory_space<vmem>>, vector<2x256xf32>
    %6 = vector.extract_strided_slice %5 {offsets = [0, 0], sizes = [1, 256], strides = [1, 1]} : vector<2x256xf32> to vector<1x256xf32>
    %7 = vector.extract_strided_slice %5 {offsets = [1, 0], sizes = [1, 256], strides = [1, 1]} : vector<2x256xf32> to vector<1x256xf32>
    %8 = arith.subf %6, %7 : vector<1x256xf32>
    %9 = arith.mulf %3, %3 : vector<24x256xf32>
    %cst = arith.constant dense<0.000000e+00> : vector<24xf32>
    %10 = vector.multi_reduction <add>, %9, %cst [1] : vector<24x256xf32> to vector<24xf32>
    %11 = vector.shape_cast %10 : vector<24xf32> to vector<24x1xf32>
    %12 = arith.mulf %4, %4 : vector<24x256xf32>
    %cst_6 = arith.constant dense<0.000000e+00> : vector<24xf32>
    %13 = vector.multi_reduction <add>, %12, %cst_6 [1] : vector<24x256xf32> to vector<24xf32>
    %14 = vector.shape_cast %13 : vector<24xf32> to vector<24x1xf32>
    %15 = arith.mulf %3, %4 : vector<24x256xf32>
    %cst_7 = arith.constant dense<0.000000e+00> : vector<24xf32>
    %16 = vector.multi_reduction <add>, %15, %cst_7 [1] : vector<24x256xf32> to vector<24xf32>
    %17 = vector.shape_cast %16 : vector<24xf32> to vector<24x1xf32>
    %18 = vector.broadcast %8 : vector<1x256xf32> to vector<24x256xf32>
    %19 = arith.mulf %3, %18 : vector<24x256xf32>
    %cst_8 = arith.constant dense<0.000000e+00> : vector<24xf32>
    %20 = vector.multi_reduction <add>, %19, %cst_8 [1] : vector<24x256xf32> to vector<24xf32>
    %21 = vector.shape_cast %20 : vector<24xf32> to vector<24x1xf32>
    %22 = vector.broadcast %8 : vector<1x256xf32> to vector<24x256xf32>
    %23 = arith.mulf %4, %22 : vector<24x256xf32>
    %cst_9 = arith.constant dense<0.000000e+00> : vector<24xf32>
    %24 = vector.multi_reduction <add>, %23, %cst_9 [1] : vector<24x256xf32> to vector<24xf32>
    %25 = vector.shape_cast %24 : vector<24xf32> to vector<24x1xf32>
    %cst_10 = arith.constant 1.000000e-24 : f32
    %26 = vector.broadcast %cst_10 : f32 to vector<24x1xf32>
    %27 = arith.maximumf %11, %26 : vector<24x1xf32>
    %28 = math.rsqrt %27 : vector<24x1xf32>
    %cst_11 = arith.constant 1.000000e-24 : f32
    %29 = vector.broadcast %cst_11 : f32 to vector<24x1xf32>
    %30 = arith.maximumf %14, %29 : vector<24x1xf32>
    %31 = math.rsqrt %30 : vector<24x1xf32>
    %32 = arith.mulf %28, %28 : vector<24x1xf32>
    %33 = arith.mulf %11, %32 : vector<24x1xf32>
    %34 = arith.mulf %31, %31 : vector<24x1xf32>
    %35 = arith.mulf %14, %34 : vector<24x1xf32>
    %36 = arith.addf %33, %35 : vector<24x1xf32>
    %37 = arith.mulf %17, %28 : vector<24x1xf32>
    %38 = arith.mulf %37, %31 : vector<24x1xf32>
    %cst_12 = arith.constant 2.000000e+00 : f32
    %39 = vector.broadcast %cst_12 : f32 to vector<24x1xf32>
    %40 = arith.mulf %39, %38 : vector<24x1xf32>
    %41 = arith.subf %36, %40 : vector<24x1xf32>
    %c0_13 = arith.constant 0 : index
    %c0_14 = arith.constant 0 : index
    %42 = vector.load %arg4[%c0_13, %c0_14] : memref<24x1xi32, #tpu.memory_space<vmem>>, vector<24x1xi32>
    %c1_i32 = arith.constant 1 : i32
    %43 = vector.broadcast %c1_i32 : i32 to vector<24x1xi32>
    %44 = arith.cmpi eq, %42, %43 : vector<24x1xi32>
    %45 = arith.mulf %21, %28 : vector<24x1xf32>
    %46 = arith.mulf %25, %31 : vector<24x1xf32>
    %cst_15 = arith.constant 4.000000e-01 : f32
    %47 = vector.broadcast %cst_15 : f32 to vector<24x1xf32>
    %48 = arith.addf %45, %47 : vector<24x1xf32>
    %cst_16 = arith.constant 1.000000e-01 : f32
    %49 = vector.broadcast %cst_16 : f32 to vector<24x1xf32>
    %50 = arith.subf %49, %45 : vector<24x1xf32>
    %51 = arith.select %44, %48, %50 : vector<24x1xi1>, vector<24x1xf32>
    %cst_17 = arith.constant 3.000000e+01 : f32
    %52 = vector.broadcast %cst_17 : f32 to vector<24x1xf32>
    %53 = arith.mulf %52, %51 : vector<24x1xf32>
    %cst_18 = arith.constant 4.000000e-01 : f32
    %54 = vector.broadcast %cst_18 : f32 to vector<24x1xf32>
    %55 = arith.addf %46, %54 : vector<24x1xf32>
    %cst_19 = arith.constant 1.000000e-01 : f32
    %56 = vector.broadcast %cst_19 : f32 to vector<24x1xf32>
    %57 = arith.subf %56, %46 : vector<24x1xf32>
    %58 = arith.select %44, %55, %57 : vector<24x1xi1>, vector<24x1xf32>
    %cst_20 = arith.constant 3.000000e+01 : f32
    %59 = vector.broadcast %cst_20 : f32 to vector<24x1xf32>
    %60 = arith.mulf %59, %58 : vector<24x1xf32>
    %cst_21 = arith.constant 0.000000e+00 : f32
    %61 = vector.broadcast %cst_21 : f32 to vector<24x1xf32>
    %62 = arith.maximumf %53, %61 : vector<24x1xf32>
    %63 = math.absf %53 : vector<24x1xf32>
    %cst_22 = arith.constant 0.000000e+00 : f32
    %64 = vector.broadcast %cst_22 : f32 to vector<24x1xf32>
    %65 = arith.subf %64, %63 : vector<24x1xf32>
    %66 = math.exp %65 : vector<24x1xf32>
    %cst_23 = arith.constant 1.000000e+00 : f32
    %67 = vector.broadcast %cst_23 : f32 to vector<24x1xf32>
    %68 = arith.addf %67, %66 : vector<24x1xf32>
    %69 = math.log %68 : vector<24x1xf32>
    %70 = arith.addf %62, %69 : vector<24x1xf32>
    %cst_24 = arith.constant 0.000000e+00 : f32
    %71 = vector.broadcast %cst_24 : f32 to vector<24x1xf32>
    %72 = arith.maximumf %60, %71 : vector<24x1xf32>
    %73 = math.absf %60 : vector<24x1xf32>
    %cst_25 = arith.constant 0.000000e+00 : f32
    %74 = vector.broadcast %cst_25 : f32 to vector<24x1xf32>
    %75 = arith.subf %74, %73 : vector<24x1xf32>
    %76 = math.exp %75 : vector<24x1xf32>
    %cst_26 = arith.constant 1.000000e+00 : f32
    %77 = vector.broadcast %cst_26 : f32 to vector<24x1xf32>
    %78 = arith.addf %77, %76 : vector<24x1xf32>
    %79 = math.log %78 : vector<24x1xf32>
    %80 = arith.addf %72, %79 : vector<24x1xf32>
    %81 = vector.shape_cast %41 : vector<24x1xf32> to vector<1x24x1xf32>
    %cst_27 = arith.constant dense<0.000000e+00> : vector<1xf32>
    %82 = vector.multi_reduction <add>, %81, %cst_27 [1, 2] : vector<1x24x1xf32> to vector<1xf32>
    %83 = vector.shape_cast %82 : vector<1xf32> to vector<1x1x1xf32>
    %84 = vector.extract %83[0, 0, 0] : f32 from vector<1x1x1xf32>
    %cst_28 = arith.constant 1.62760422E-4 : f32
    %85 = arith.mulf %cst_28, %84 : f32
    %86 = arith.addf %70, %80 : vector<24x1xf32>
    %87 = vector.shape_cast %86 : vector<24x1xf32> to vector<1x24x1xf32>
    %cst_29 = arith.constant dense<0.000000e+00> : vector<1xf32>
    %88 = vector.multi_reduction <add>, %87, %cst_29 [1, 2] : vector<1x24x1xf32> to vector<1xf32>
    %89 = vector.shape_cast %88 : vector<1xf32> to vector<1x1x1xf32>
    %90 = vector.extract %89[0, 0, 0] : f32 from vector<1x1x1xf32>
    %cst_30 = arith.constant 0.0416666679 : f32
    %91 = arith.mulf %cst_30, %90 : f32
    %92 = arith.addf %85, %91 : f32
    %c0_31 = arith.constant 0 : index
    %c0_32 = arith.constant 0 : index
    %c0_33 = arith.constant 0 : index
    %93 = vector.load %arg6[%c0_31, %c0_32, %c0_33] : memref<1x1x1xf32, #tpu.memory_space<vmem>>, vector<1x1x1xf32>
    %94 = vector.broadcast %92 : f32 to vector<1x1x1xf32>
    %95 = arith.addf %93, %94 : vector<1x1x1xf32>
    %c0_34 = arith.constant 0 : index
    %c0_35 = arith.constant 0 : index
    %c0_36 = arith.constant 0 : index
    %96 = vector.load %arg6[%c0_34, %c0_35, %c0_36] : memref<1x1x1xf32, #tpu.memory_space<vmem>>, vector<1x1x1xf32>
    tpu.vector_store %arg6[%c0_34, %c0_35, %c0_36], %95 {strides = array<i32>} : memref<1x1x1xf32, #tpu.memory_space<vmem>>, vector<1x1x1xf32>,
    return
  }
  func.func @transform_0(%arg0: i32, %arg1: i32) -> (i32, i32) {
    %c1_i32 = arith.constant 1 : i32
    %0 = arith.muli %arg0, %c1_i32 : i32
    %1 = arith.addi %0, %arg1 : i32
    %c0_i32 = arith.constant 0 : i32
    %c0_i32_0 = arith.constant 0 : i32
    return %1, %c0_i32 : i32, i32
  }
  func.func @transform_1(%arg0: i32, %arg1: i32) -> (i32, i32) {
    %c1_i32 = arith.constant 1 : i32
    %0 = arith.muli %arg0, %c1_i32 : i32
    %1 = arith.addi %0, %arg1 : i32
    %c0_i32 = arith.constant 0 : i32
    %c0_i32_0 = arith.constant 0 : i32
    return %1, %c0_i32 : i32, i32
  }
  func.func @transform_2(%arg0: i32, %arg1: i32) -> (i32, i32) {
    %c1_i32 = arith.constant 1 : i32
    %0 = arith.muli %arg0, %c1_i32 : i32
    %1 = arith.addi %0, %arg1 : i32
    %c0_i32 = arith.constant 0 : i32
    %c0_i32_0 = arith.constant 0 : i32
    return %1, %c0_i32 : i32, i32
  }
  func.func @transform_3(%arg0: i32, %arg1: i32) -> (i32, i32) {
    %c0_i32 = arith.constant 0 : i32
    %c0_i32_0 = arith.constant 0 : i32
    %c0_i32_1 = arith.constant 0 : i32
    return %c0_i32, %c0_i32_0 : i32, i32
  }
  func.func @transform_4(%arg0: i32, %arg1: i32) -> (i32, i32, i32) {
    %c0_i32 = arith.constant 0 : i32
    %c0_i32_0 = arith.constant 0 : i32
    %c0_i32_1 = arith.constant 0 : i32
    return %arg0, %c0_i32, %c0_i32_0 : i32, i32, i32
  }
}

</mosaic_0001>

<bundles_post_ra>
// kernel: tpu_custom_call.1
= control target key start
LH: loop header
LB: loop body
LE: loop exit
PB: predicated region body
PF: predicated region fallthrough
CT: control target
= control target key end

     0   :  { %9 = vsyncpa [#allocation3], 0  ;;  %s644_s0 = inlined_call_operand.hbm [shape: f32[24,256], index: 0, kind: input, shape index: {}]   ;;  %s645_s1 = inlined_call_operand.hbm [shape: f32[24,256], index: 1, kind: input, shape index: {}]   ;;  %s646_s2 = inlined_call_operand.vmem [shape: s32[24,1], index: 2, kind: input, shape index: {}]   ;;  %s647_s3 = inlined_call_operand.vmem [shape: f32[2,256], index: 3, kind: input, shape index: {}]   ;;  %s648_s4 = inlined_call_operand.hbm [shape: f32[1,1,1], index: 4, kind: output, shape index: {}]  }
   0x1   :  { %10 = vsyncpa [#allocation6], 0 }
   0x2   :  { %11 = vsyncpa [#allocation4], 0  ;;  %s504_s15 = smov [#allocation2]  }
   0x3   :  { %s22_s16 = sshll.u32 %s504_s15, 4  ;;  %s23_s16 = int_to_ptr.vmem [resolvable:$true] %s22_s16 }
   0x4   :  { %s446_s17 = scalar_lea.vmem %s23_s16, 768  ;;  %p451_p1 = scmp.lt.s32.totalorder %s23_s16, %s23_s16 }
   0x5   :  { %p447_p0 = scmp.ne.s32.totalorder %s23_s16, %s446_s17  ;;  %p452_p2 = scmp.lt.s32.totalorder %s446_s17, %s446_s17 }
   0x7   :  { %p453_p3 = por %p452_p2, %p451_p1 }
   0x9   :  { %p454_p4 = pnand %p453_p3, %p447_p0 }
   0xb   :  { %457 = shalt.err (!%p454_p4)
}
   0xc   :  { %s505_s18 = smov 256   ;;  %s506_s19 = smov 16  }
   0xd   :  { %28 = dma.hbm_to_vmem [thread:$0]  %s644_s0, 768, %s23_s16, [#allocation3], %s505_s18, %s505_s18, %s506_s19  }
   0xe   :  { %s507_s22 = smov [#allocation5]  }
   0xf   :  { %s39_s23 = sshll.u32 %s507_s22, 4  ;;  %s40_s23 = int_to_ptr.vmem [resolvable:$true] %s39_s23 }
  0x10   :  { %s466_s24 = scalar_lea.vmem %s40_s23, 768  ;;  %p471_p6 = scmp.lt.s32.totalorder %s40_s23, %s40_s23 }
  0x11   :  { %p467_p5 = scmp.ne.s32.totalorder %s40_s23, %s466_s24  ;;  %p472_p7 = scmp.lt.s32.totalorder %s466_s24, %s466_s24 }
  0x13   :  { %p473_p8 = por %p472_p7, %p471_p6 }
  0x15   :  { %p474_p9 = pnand %p473_p8, %p467_p5 }
  0x17   :  { %477 = shalt.err (!%p474_p9)
}
  0x18   :  { %45 = dma.hbm_to_vmem [thread:$0]  %s645_s1, 768, %s40_s23, [#allocation6], %s505_s18, %s505_s18, %s506_s19  }
  0x19   :  { %498 = dma.done.wait [#allocation3], 768  }
  0x1a   :  { %499 = vsyncadd [#allocation3], 4294966528 }
  0x1b   :  { %500 = dma.done.wait [#allocation6], 768  }
  0x1c   :  { %501 = vsyncadd [#allocation6], 4294966528  ;;  %v152_v0 = vlaneseq  ;;  %v541_v1 = vld [vmem:[#allocation5] sm:$0xff]  ;;  %v543_v2 = vld [vmem:[#allocation5 + $0x8] sm:$0xff]  ;;  %vm329_vm3 = vcmask 7168   ;;  %vm86_vm4 = vcmask 0  }
  0x1d   :  { %v545_v3 = vld [vmem:[#allocation2] sm:$0xff]  ;;  %v121_v5 = vmul.f32 %v541_v1, %v541_v1  ;;  %v122_v6 = vmul.f32 %v543_v2, %v543_v2  ;;  %v551_v7 = vld [vmem:[#allocation2 + $0x8] sm:$0xff]  ;;  %v90_v14 = vld [vmem:[#allocation2 + $0x10] sm:$0xff]  ;;  %s509_s10 = smov [#allocation7]  }
  0x1e   :  { %v153_v4 = vshrl.u32 %v152_v0, 7  ;;  %v106_v8 = vmul.f32 %v545_v3, %v545_v3  ;;  %v96_v9 = vld [vmem:[#allocation5 + $0x10] sm:$0xff]  ;;  %v97_v10 = vld [vmem:[#allocation5 + $0x18] sm:$0xff]  ;;  %v107_v11 = vmul.f32 %v551_v7, %v551_v7  ;;  %v91_v15 = vld [vmem:[#allocation2 + $0x18] sm:$0xff]  ;;  %v108_v18 = vmul.f32 %v90_v14, %v90_v14  ;;  %s375_s11 = sshll.u32 %s509_s10, 4  ;;  %s376_s11 = int_to_ptr.vmem [resolvable:$true] %s375_s11 }
  0x1f   :  { %v123_v12 = vmul.f32 %v96_v9, %v96_v9  ;;  %v124_v13 = vmul.f32 %v97_v10, %v97_v10  ;;  %v98_v16 = vld [vmem:[#allocation5 + $0x20] sm:$0xff]  ;;  %v127_v17 = vadd.f32 %v122_v6, %v121_v5  ;;  %v109_v19 = vmul.f32 %v91_v15, %v91_v15  ;;  %v99_v20 = vld [vmem:[#allocation5 + $0x28] sm:$0xff]  ;;  %v92_v21 = vld [vmem:[#allocation2 + $0x20] sm:$0xff]  ;;  %s478_s12 = scalar_lea.vmem %s376_s11, 16  ;;  %s482_s13 = scalar_lea.vmem %s376_s11, 32 }
  0x20   :  { %v93_v22 = vld [vmem:[#allocation2 + $0x28] sm:$0xff]  ;;  %v112_v23 = vadd.f32 %v107_v11, %v106_v8  ;;  %v100_v24 = vld [vmem:[%s647_s3] sm:$0xf]  ;;  %v154_v25 = vsub.s32 0, %v153_v4  ;;  %v158_v26 = vsub.s32 2, %v153_v4  ;;  %v125_v28 = vmul.f32 %v98_v16, %v98_v16  ;;  %p479_p10 = scmp.ne.s32.totalorder %s376_s11, %s478_s12  ;;  %p483_p11 = scmp.lt.s32.totalorder %s376_s11, %s376_s11 }
  0x21   :  { %128 = vadd.xlane.f32.xlu1 %v127_v17  ;;  %v130_v27 = vadd.f32 %v124_v13, %v123_v12  ;;  %v126_v29 = vmul.f32 %v99_v20, %v99_v20  ;;  %v391_v30 = vrot.slane %v100_v24, 9  ;;  %v115_v31 = vadd.f32 %v109_v19, %v108_v18  ;;  %v239_v19 = vld [vmem:[%s646_s2] sm:$0xff]  ;;  %p484_p12 = scmp.lt.s32.totalorder %s482_s13, %s478_s12 }
  0x22   :  { %113 = vadd.xlane.f32.xlu0 %v112_v23  ;;  %v110_v32 = vmul.f32 %v92_v21, %v92_v21  ;;  %v111_v33 = vmul.f32 %v93_v22, %v93_v22  ;;  %v138_v58 = vmul.f32 %v96_v9, %v90_v14  ;;  %v139_v59 = vmul.f32 %v97_v10, %v91_v15  ;;  %v240_v23 = vld [vmem:[%s646_s2 + $0x8] sm:$0xff] }
  0x23   :  { %v105_v34 = vsub.f32 %v100_v24, %v391_v30  ;;  %v133_v35 = vadd.f32 %v126_v29, %v125_v28  ;;  %v136_v61 = vmul.f32 %v541_v1, %v545_v3  ;;  %v137_v62 = vmul.f32 %v543_v2, %v551_v7  ;;  %p485_p13 = por %p484_p12, %p483_p11 }
  0x24   :  { %v118_v38 = vadd.f32 %v111_v33, %v110_v32  ;;  %v145_v63 = vadd.f32 %v139_v59, %v138_v58  ;;  %v140_v4 = vmul.f32 %v98_v16, %v92_v21  ;;  %v141_v5 = vmul.f32 %v99_v20, %v93_v22 }
  0x25   :  { %131 = vadd.xlane.f32.xlu1 %v130_v27  ;;  %v155_v36 = vrot.slane %v105_v34, %v154_v25  ;;  %v159_v37 = vrot.slane %v105_v34, %v158_v26  ;;  %v142_v0 = vadd.f32 %v137_v62, %v136_v61  ;;  %vm242_vm0 = vcmp.eq.s32.totalorder %v239_v19, 1  ;;  %p486_p0 = pnand %p485_p13, %p479_p10 }
  0x26   :  { %116 = vadd.xlane.f32.xlu0 %v115_v31  ;;  %v148_v6 = vadd.f32 %v141_v5, %v140_v4  ;;  %vm243_vm1 = vcmp.eq.s32.totalorder %v240_v23, 1 }
  0x27   :  { %v165_v39 = vrot.slane %v155_v36, %v154_v25  ;;  %v169_v40 = vrot.slane %v159_v37, %v154_v25 }
  0x29   :  { %134 = vadd.xlane.f32.xlu1 %v133_v35  ;;  %v172_v41 = vmul.f32 %v165_v39, %v90_v14  ;;  %v173_v42 = vmul.f32 %v169_v40, %v91_v15  ;;  %v170_v43 = vmul.f32 %v165_v39, %v545_v3  ;;  %v171_v44 = vmul.f32 %v169_v40, %v551_v7 }
  0x2a   :  { %119 = vadd.xlane.f32.xlu0 %v118_v38  ;;  %v187_v45 = vmul.f32 %v165_v39, %v96_v9  ;;  %v188_v46 = vmul.f32 %v169_v40, %v97_v10  ;;  %v185_v47 = vmul.f32 %v165_v39, %v541_v1  ;;  %v186_v48 = vmul.f32 %v169_v40, %v543_v2 }
  0x2b   :  { %v179_v49 = vadd.f32 %v173_v42, %v172_v41  ;;  %v176_v50 = vadd.f32 %v171_v44, %v170_v43  ;;  %v189_v52 = vmul.f32 %v165_v39, %v98_v16  ;;  %v190_v53 = vmul.f32 %v169_v40, %v99_v20 }
  0x2c   :  { %v194_v51 = vadd.f32 %v188_v46, %v187_v45  ;;  %v191_v54 = vadd.f32 %v186_v48, %v185_v47  ;;  %v174_v55 = vmul.f32 %v165_v39, %v92_v21  ;;  %v175_v56 = vmul.f32 %v169_v40, %v93_v22 }
  0x2d   :  { %180 = vadd.xlane.f32.xlu1 %v179_v49  ;;  %v197_v57 = vadd.f32 %v190_v53, %v189_v52  ;;  %v241_v49 = vld [vmem:[%s646_s2 + $0x10] sm:$0xff] }
  0x2e   :  { %177 = vadd.xlane.f32.xlu0 %v176_v50  ;;  %v182_v60 = vadd.f32 %v175_v56, %v174_v55  ;;  %vm244_vm2 = vcmp.eq.s32.totalorder %v241_v49, 1 }
  0x31   :  { %195 = vadd.xlane.f32.xlu1 %v194_v51 }
  0x32   :  { %192 = vadd.xlane.f32.xlu0 %v191_v54 }
  0x35   :  { %198 = vadd.xlane.f32.xlu1 %v197_v57 }
  0x36   :  { %183 = vadd.xlane.f32.xlu0 %v182_v60 }
  0x39   :  { %146 = vadd.xlane.f32.xlu1 %v145_v63 }
  0x3a   :  { %143 = vadd.xlane.f32.xlu0 %v142_v0 }
  0x3e   :  { %149 = vadd.xlane.f32.xlu0 %v148_v6 }
  0xaa   :  { %v568_v8 = vpop.xlane.xlu1 %128 }
  0xab   :  { %v206_v9 = vmax.f32 %v568_v8, 1e-24  ;;  %v571_v10 = vpop.xlane.xlu0 %113 }
  0xac   :  { %v200_v1 = vmax.f32 %v571_v10, 1e-24 }
  0xad   :  { %402 = vrsqrt.f32 %v206_v9 }
  0xae   :  { %404 = vrsqrt.f32 %v200_v1  ;;  %v132_v2 = vpop.xlane.xlu1 %131 }
  0xaf   :  { %v207_v3 = vmax.f32 %v132_v2, 1e-24  ;;  %v117_v7 = vpop.xlane.xlu0 %116 }
  0xb0   :  { %v201_v11 = vmax.f32 %v117_v7, 1e-24 }
  0xb1   :  { %406 = vrsqrt.f32 %v207_v3 }
  0xb2   :  { %408 = vrsqrt.f32 %v201_v11  ;;  %v135_v12 = vpop.xlane.xlu1 %134 }
  0xb3   :  { %v208_v13 = vmax.f32 %v135_v12, 1e-24  ;;  %v120_v14 = vpop.xlane.xlu0 %119 }
  0xb4   :  { %v202_v15 = vmax.f32 %v120_v14, 1e-24 }
  0xb5   :  { %410 = vrsqrt.f32 %v208_v13 }
  0xb6   :  { %412 = vrsqrt.f32 %v202_v15  ;;  %v181_v16 = vpop.xlane.xlu1 %180 }
  0xb7   :  { %v178_v17 = vpop.xlane.xlu0 %177 }
  0xba   :  { %v574_v18 = vpop.eup %402  ;;  %v196_v21 = vpop.xlane.xlu1 %195 }
  0xbb   :  { %v579_v20 = vpop.eup %404  ;;  %v193_v22 = vpop.xlane.xlu0 %192  ;;  %v218_v35 = vmul.f32 %v574_v18, %v574_v18 }
  0xbc   :  { %v245_v24 = vmul.f32 %v579_v20, %v178_v17  ;;  %v248_v25 = vmul.f32 %v574_v18, %v193_v22  ;;  %v212_v39 = vmul.f32 %v579_v20, %v579_v20 }
  0xbd   :  { %v221_v62 = vmul.f32 %v218_v35, %v568_v8 }
  0xbe   :  { %v586_v26 = vpop.eup %406  ;;  %v251_v27 = vadd.f32 0.4, %v245_v24  ;;  %v254_v28 = vsub.f32 0.1, %v245_v24  ;;  %v263_v29 = vadd.f32 0.4, %v248_v25  ;;  %v199_v43 = vpop.xlane.xlu1 %198  ;;  %v215_v63 = vmul.f32 %v212_v39, %v571_v10 }
  0xbf   :  { %v409_v30 = vpop.eup %408  ;;  %v219_v31 = vmul.f32 %v586_v26, %v586_v26  ;;  %v249_v32 = vmul.f32 %v586_v26, %v196_v21  ;;  %v266_v33 = vsub.f32 0.1, %v248_v25  ;;  %v184_v34 = vpop.xlane.xlu0 %183 }
  0xc0   :  { %v213_v36 = vmul.f32 %v409_v30, %v409_v30  ;;  %v246_v37 = vmul.f32 %v409_v30, %v181_v16  ;;  %v257_v38 = vsel %vm242_vm0, %v251_v27, %v254_v28 }
  0xc1   :  { %v596_v40 = vmul.f32 30.0, %v257_v38  ;;  %v264_v41 = vadd.f32 0.4, %v249_v32  ;;  %v267_v42 = vsub.f32 0.1, %v249_v32  ;;  %v222_v45 = vmul.f32 %v219_v31, %v132_v2 }
  0xc2   :  { %v411_v44 = vpop.eup %410  ;;  %v252_v46 = vadd.f32 0.4, %v246_v37  ;;  %v255_v47 = vsub.f32 0.1, %v246_v37  ;;  %v269_v48 = vsel %vm242_vm0, %v263_v29, %v266_v33  ;;  %v216_v51 = vmul.f32 %v213_v36, %v117_v7  ;;  %v147_v2 = vpop.xlane.xlu1 %146 }
  0xc3   :  { %v413_v50 = vpop.eup %412  ;;  %v220_v52 = vmul.f32 %v411_v44, %v411_v44  ;;  %v278_v53 = vand.u32 2147483647, %v596_v40  ;;  %v270_v54 = vsel %vm243_vm1, %v264_v41, %v267_v42  ;;  %v144_v58 = vpop.xlane.xlu0 %143  ;;  %v609_v61 = vmul.f32 30.0, %v269_v48 }
  0xc4   :  { %v214_v55 = vmul.f32 %v413_v50, %v413_v50  ;;  %v258_v56 = vsel %vm243_vm1, %v252_v46, %v255_v47  ;;  %v605_v57 = vmul.f32 30.0, %v270_v54  ;;  %v250_v4 = vmul.f32 %v411_v44, %v199_v43 }
  0xc5   :  { %v607_v59 = vmul.f32 30.0, %v258_v56  ;;  %v281_v60 = vsub.f32 0.0, %v278_v53  ;;  %v225_v5 = vadd.f32 %v222_v45, %v216_v51  ;;  %v223_v6 = vmul.f32 %v220_v52, %v135_v12 }
  0xc6   :  { %v306_v0 = vand.u32 2147483647, %v605_v57  ;;  %v217_v3 = vmul.f32 %v214_v55, %v120_v14  ;;  %v305_v11 = vand.u32 2147483647, %v609_v61  ;;  %v265_v13 = vadd.f32 0.4, %v250_v4 }
  0xc7   :  { %v279_v9 = vand.u32 2147483647, %v607_v59  ;;  %v284_v1 = vmul.f32 1.442695, %v281_v60  ;;  %v268_v16 = vsub.f32 0.1, %v250_v4  ;;  %v247_v8 = vmul.f32 %v413_v50, %v184_v34  ;;  %v150_v22 = vpop.xlane.xlu0 %149 }
  0xc8   :  { %v309_v7 = vsub.f32 0.0, %v306_v0  ;;  %v308_v10 = vsub.f32 0.0, %v305_v11  ;;  %v228_v19 = vmul.f32 %v409_v30, %v147_v2  ;;  %v227_v21 = vmul.f32 %v579_v20, %v144_v58 }
  0xc9   :  { %v282_v15 = vsub.f32 0.0, %v279_v9  ;;  %414 = vpow2.f32 %v284_v1  ;;  %v271_v23 = vsel %vm244_vm2, %v265_v13, %v268_v16  ;;  %v253_v24 = vadd.f32 0.4, %v247_v8 }
  0xca   :  { %v313_v17 = vmul.f32 1.442695, %v309_v7  ;;  %v256_v25 = vsub.f32 0.1, %v247_v8  ;;  %v311_v14 = vmul.f32 1.442695, %v308_v10  ;;  %v231_v28 = vmul.f32 %v586_v26, %v228_v19 }
  0xcb   :  { %v286_v12 = vmul.f32 1.442695, %v282_v15  ;;  %v618_v27 = vmul.f32 30.0, %v271_v23  ;;  %v230_v31 = vmul.f32 %v574_v18, %v227_v21  ;;  %v229_v30 = vmul.f32 %v413_v50, %v150_v22 }
  0xcc   :  { %416 = vpow2.f32 %v313_v17  ;;  %v259_v29 = vsel %vm244_vm2, %v253_v24, %v256_v25  ;;  %v234_v33 = vmul.f32 2.0, %v231_v28  ;;  %v224_v34 = vadd.f32 %v221_v62, %v215_v63 }
  0xcd   :  { %418 = vpow2.f32 %v286_v12  ;;  %v307_v20 = vand.u32 2147483647, %v618_v27  ;;  %v624_v32 = vmul.f32 30.0, %v259_v29  ;;  %v233_v35 = vmul.f32 2.0, %v230_v31 }
  0xce   :  { %420 = vpow2.f32 %v311_v14  ;;  %v232_v36 = vmul.f32 %v411_v44, %v229_v30  ;;  %v237_v26 = vsub.f32 %v225_v5, %v234_v33  ;;  %v226_v39 = vadd.f32 %v223_v6, %v217_v3 }
  0xcf   :  { %v310_v37 = vsub.f32 0.0, %v307_v20  ;;  %v280_v38 = vand.u32 2147483647, %v624_v32  ;;  %v236_v41 = vsub.f32 %v224_v34, %v233_v35  ;;  %v276_v7 = vmax.f32 %v607_v59, 0.0 }
  0xd0   :  { %v235_v42 = vmul.f32 2.0, %v232_v36  ;;  %v331_v45 = vsel %vm329_vm3, %v237_v26, 0.0  ;;  %v303_v11 = vmax.f32 %v605_v57, 0.0  ;;  %v275_v16 = vmax.f32 %v596_v40, 0.0 }
  0xd1   :  { %v315_v43 = vmul.f32 1.442695, %v310_v37  ;;  %v283_v18 = vsub.f32 0.0, %v280_v38  ;;  %v330_v47 = vsel %vm329_vm3, %v236_v41, 0.0  ;;  %v302_v8 = vmax.f32 %v609_v61, 0.0 }
  0xd2   :  { %v238_v46 = vsub.f32 %v226_v39, %v235_v42  ;;  %v332_v49 = vadd.f32 %v331_v45, %v330_v47  ;;  %v304_v12 = vmax.f32 %v618_v27, 0.0  ;;  %v277_v59 = vmax.f32 %v624_v32, 0.0 }
  0xd3   :  { %422 = vpow2.f32 %v315_v43  ;;  %v288_v48 = vmul.f32 1.442695, %v283_v18  ;;  %v508_v27 = vmov 0.0  }
  0xd4   :  { %v333_v44 = vsel %vm329_vm3, %v238_v46, 0.0  ;;  %87 = vst.msk [vmem:[#allocation7] sm:$0x1] %vm86_vm4, %v508_v27 }
  0xd5   :  { %424 = vpow2.f32 %v288_v48  ;;  %v334_v51 = vadd.f32 %v333_v44, %v332_v49 }
  0xd6   :  { %v415_v50 = vpop.eup %414 }
  0xd7   :  { %v290_v52 = vadd.f32 1.0, %v415_v50  ;;  %335 = vadd.xlane.f32.xlu1 %v334_v51 }
  0xd9   :  { %v417_v53 = vpop.eup %416  ;;  %426 = vlog2.f32 %v290_v52 }
  0xda   :  { %v419_v54 = vpop.eup %418  ;;  %v318_v55 = vadd.f32 1.0, %v417_v53 }
  0xdb   :  { %v421_v56 = vpop.eup %420  ;;  %v291_v58 = vadd.f32 1.0, %v419_v54  ;;  %v364_v47 = vld [vmem:[#allocation7] sm:$0x1] }
  0xdc   :  { %v317_v60 = vadd.f32 1.0, %v421_v56  ;;  %428 = vlog2.f32 %v318_v55 }
  0xdd   :  { %430 = vlog2.f32 %v291_v58 }
  0xde   :  { %432 = vlog2.f32 %v317_v60 }
  0xe0   :  { %v423_v62 = vpop.eup %422 }
  0xe1   :  { %v319_v63 = vadd.f32 1.0, %v423_v62 }
  0xe2   :  { %v425_v0 = vpop.eup %424 }
  0xe3   :  { %v292_v4 = vadd.f32 1.0, %v425_v0  ;;  %434 = vlog2.f32 %v319_v63 }
  0xe5   :  { %436 = vlog2.f32 %v292_v4 }
  0xe6   :  { %v427_v5 = vpop.eup %426 }
  0xe7   :  { %v294_v13 = vmul.f32 0.6931472, %v427_v5 }
  0xe9   :  { %v429_v6 = vpop.eup %428  ;;  %v299_v19 = vadd.f32 %v294_v13, %v275_v16 }
  0xea   :  { %v431_v9 = vpop.eup %430  ;;  %v323_v1 = vmul.f32 0.6931472, %v429_v6 }
  0xeb   :  { %v433_v2 = vpop.eup %432  ;;  %v296_v3 = vmul.f32 0.6931472, %v431_v9 }
  0xec   :  { %v321_v15 = vmul.f32 0.6931472, %v433_v2  ;;  %v327_v10 = vadd.f32 %v323_v1, %v303_v11 }
  0xed   :  { %v300_v17 = vadd.f32 %v296_v3, %v276_v7 }
  0xee   :  { %v326_v21 = vadd.f32 %v321_v15, %v302_v8 }
  0xef   :  { %v346_v24 = vadd.f32 %v327_v10, %v300_v17 }
  0xf0   :  { %v435_v22 = vpop.eup %434  ;;  %v345_v28 = vadd.f32 %v326_v21, %v299_v19 }
  0xf1   :  { %v325_v23 = vmul.f32 0.6931472, %v435_v22  ;;  %v349_v40 = vsel %vm329_vm3, %v346_v24, 0.0 }
  0xf2   :  { %v437_v25 = vpop.eup %436  ;;  %v348_v61 = vsel %vm329_vm3, %v345_v28, 0.0 }
  0xf3   :  { %v298_v14 = vmul.f32 0.6931472, %v437_v25  ;;  %v328_v57 = vadd.f32 %v325_v23, %v304_v12  ;;  %v350_v30 = vadd.f32 %v349_v40, %v348_v61 }
  0xf5   :  { %v301_v29 = vadd.f32 %v298_v14, %v277_v59 }
  0xf7   :  { %v347_v31 = vadd.f32 %v328_v57, %v301_v29 }
  0xf9   :  { %v351_v20 = vsel %vm329_vm3, %v347_v31, 0.0 }
  0xfa   :  { %v352_v33 = vadd.f32 %v351_v20, %v350_v30 }
  0xfc   :  { %353 = vadd.xlane.f32.xlu0 %v352_v33 }
 0x160   :  { %v336_v34 = vpop.xlane.xlu1 %335 }
 0x161   :  { %v337_v32 = vrot.slane %v336_v34, 4 }
 0x163   :  { %v338_v35 = vadd.f32 %v337_v32, %v336_v34 }
 0x165   :  { %v339_v36 = vrot.slane %v338_v35, 2 }
 0x167   :  { %v340_v37 = vadd.f32 %v339_v36, %v338_v35 }
 0x169   :  { %v341_v38 = vrot.slane %v340_v37, 1 }
 0x16b   :  { %v342_v26 = vadd.f32 %v341_v38, %v340_v37 }
 0x16d   :  { %392 = vpush %v342_v26 }
 0x185   :  { %v354_v39 = vpop.xlane.xlu0 %353 }
 0x186   :  { %v355_v41 = vrot.slane %v354_v39, 4 }
 0x188   :  { %v356_v42 = vadd.f32 %v355_v41, %v354_v39 }
 0x18a   :  { %v357_v43 = vrot.slane %v356_v42, 2 }
 0x18c   :  { %v358_v18 = vadd.f32 %v357_v43, %v356_v42 }
 0x18e   :  { %v359_v45 = vrot.slane %v358_v18, 1 }
 0x190   :  { %v360_v46 = vadd.f32 %v359_v45, %v358_v18 }
 0x192   :  { %394 = vpush %v360_v46 }
 0x19e   :  { %s393_s2 = spop %392 }
 0x19f   :  { %s344_s6 = smul.f32 0.00016276042, %s393_s2 }
 0x1c3   :  { %s395_s7 = spop %394 }
 0x1c4   :  { %s362_s8 = smul.f32 0.041666668, %s395_s7 }
 0x1c6   :  { %s363_s9 = sadd.f32 %s362_s8, %s344_s6 }
 0x1c8   :  { %v365_v48 = vstv %s363_s9 }
 0x1c9   :  { %v366_v49 = vadd.f32 %v365_v48, %v364_v47 }
 0x1cb   :  { %368 = vst.msk [vmem:[#allocation7] sm:$0x1] %vm86_vm4, %v366_v49 }
 0x1cc   :  { %489 = shalt.err (!%p486_p0)
}
 0x1cd   :  { %378 = dma.vmem_to_hbm [thread:$0]  %s376_s11, 16, %s648_s4, [#allocation4]  }
 0x1ce   :  { %502 = dma.done.wait [#allocation4], 16  }
 0x1cf   :  { %503 = vsyncadd [#allocation4], 4294967280 }
 0x1d0   :  { %382 = vsyncpa [#allocation3], 1 }
 0x1d1   :  { %383 = vsyncpa [#allocation6], 1 }
 0x1d2   :  { %384 = vsyncpa [#allocation4], 1 }

</bundles_post_ra>
